<compile_context>
chip_gen: v5e
topology: v5e:2x2
jax: 0.10.0
libtpu: 0.0.40
codegen_flags: <defaults>
</compile_context>

<pallas_src>
import jax
import jax.numpy as jnp
from jax.experimental import pallas as pl
from jax.experimental.pallas import tpu as pltpu

K_IN = 28 * 28    # 784 contraction dim (full last dim of x -> legal block)
H = 128           # hidden width
N_OUT = 10        # logits
N_SLAB = 16       # lane-trimmed output slab (full last dim of out -> legal block)


def _mlp_kernel(x_ref, w1_ref, b1_ref, w2_ref, b2_ref, o_ref):
    # x_ref : (TB, 784) f32    w1_ref: (784, 128) bf16   b1_ref: (1, 128) f32
    # w2_ref: (128, 16) bf16   b2_ref: (1, 16)    f32    o_ref : (TB, 16) f32
    x_bf = x_ref[...].astype(jnp.bfloat16)                 # on-chip cast, no HBM copy
    h = jnp.dot(x_bf, w1_ref[...], preferred_element_type=jnp.float32)
    h = jnp.maximum(h + b1_ref[...], 0.0)                  # bias + ReLU in f32 (VPU)
    y = jnp.dot(h.astype(jnp.bfloat16), w2_ref[...],
                preferred_element_type=jnp.float32) + b2_ref[...]
    o_ref[...] = y.astype(o_ref.dtype)


def prepare_params(w1, b1, w2, b2):
    """One-time weight prep from torch nn.Linear layout.
    w1: (128, 784), b1: (128,), w2: (10, 128), b2: (10,)."""
    w1t = jnp.transpose(w1).astype(jnp.bfloat16)                        # (784, 128)
    b1r = b1.reshape(1, H).astype(jnp.float32)                          # (1, 128)
    w2t = jnp.zeros((H, N_SLAB), jnp.bfloat16)
    w2t = w2t.at[:, :N_OUT].set(jnp.transpose(w2).astype(jnp.bfloat16))  # (128, 16)
    b2r = jnp.zeros((1, N_SLAB), jnp.float32)
    b2r = b2r.at[:, :N_OUT].set(b2.astype(jnp.float32))                 # (1, 16)
    return w1t, b1r, w2t, b2r


def _choose_tile_b(B):
    """Batch tile: single full tile for small B (block dim == array dim is
    always legal, even when B isn't a multiple of 8); otherwise a multiple of
    256 in [256, 2048], aiming for >= 8 grid steps so megacore sharding and
    double-buffered pipelining kick in."""
    if B <= 512:
        return B
    tb = -(-B // 8)                         # ceil(B / 8) -> ~8+ grid steps
    tb = ((tb + 255) // 256) * 256          # round up to a multiple of 256
    return max(256, min(tb, 2048))


@jax.jit
def simple_model_forward(x, w1t, b1r, w2t, b2r):
    """x: (B,1,28,28) / (B,28,28) / (B,784). Params from prepare_params().
    Returns (B, 10) float32 logits."""
    x2d = x.reshape(-1, K_IN).astype(jnp.float32)   # free reshape, no pad/cast copy
    B = x2d.shape[0]
    TB = _choose_tile_b(B)

    out = pl.pallas_call(
        _mlp_kernel,
        out_shape=jax.ShapeDtypeStruct((B, N_SLAB), jnp.float32),
        grid_spec=pltpu.PrefetchScalarGridSpec(
            num_scalar_prefetch=0,
            grid=(pl.cdiv(B, TB),),          # ragged last tile OK (rows independent)
            in_specs=[
                pl.BlockSpec((TB, K_IN), lambda i: (i, 0)),   # x streams per batch tile
                pl.BlockSpec((K_IN, H), lambda i: (0, 0)),    # weights stay VMEM-resident
                pl.BlockSpec((1, H), lambda i: (0, 0)),
                pl.BlockSpec((H, N_SLAB), lambda i: (0, 0)),
                pl.BlockSpec((1, N_SLAB), lambda i: (0, 0)),
            ],
            out_specs=pl.BlockSpec((TB, N_SLAB), lambda i: (i, 0)),
        ),
        compiler_params=pltpu.CompilerParams(
            dimension_semantics=("parallel",),   # megacore sharding on v7x
            vmem_limit_bytes=48 * 1024 * 1024,   # TB<=2048 => ~14 MiB live; <= v7x 64 MiB
        ),
    )(x2d, w1t, b1r, w2t, b2r)

    return out[:, :N_OUT]


def _init_params(key):
    # Deterministic synthetic parameters (shapes match nn.Linear layout).
    k1, k2, k3, k4 = jax.random.split(key, 4)
    lim1 = 1.0 / jnp.sqrt(784.0)
    lim2 = 1.0 / jnp.sqrt(128.0)
    w1 = jax.random.uniform(k1, (128, 784), jnp.float32, -lim1, lim1)
    b1 = jax.random.uniform(k2, (128,), jnp.float32, -lim1, lim1)
    w2 = jax.random.uniform(k3, (10, 128), jnp.float32, -lim2, lim2)
    b2 = jax.random.uniform(k4, (10,), jnp.float32, -lim2, lim2)
    return w1, b1, w2, b2


if __name__ == "__main__":
    root = jax.random.PRNGKey(0)
    kx, kp, kx2 = jax.random.split(root, 3)

    w1, b1, w2, b2 = _init_params(kp)
    params = prepare_params(w1, b1, w2, b2)          # one-time prep, hoisted

    def ref_f32(xin):
        x2d = xin.reshape(-1, K_IN)
        return jnp.maximum(x2d @ w1.T + b1, 0.0) @ w2.T + b2

    def ref_bf16(xin):                                # matched-precision reference
        x2d = xin.reshape(-1, K_IN)
        h = jnp.maximum(
            jnp.dot(x2d.astype(jnp.bfloat16), w1.T.astype(jnp.bfloat16),
                    preferred_element_type=jnp.float32) + b1, 0.0)
        return jnp.dot(h.astype(jnp.bfloat16), w2.T.astype(jnp.bfloat16),
                       preferred_element_type=jnp.float32) + b2

    # Small NCHW batch (matches the torch module's x.view(-1, 784)).
    x_small = jax.random.normal(kx, (2, 1, 28, 28), jnp.float32)
    out_small = jax.block_until_ready(simple_model_forward(x_small, *params))
    assert out_small.shape == (2, N_OUT)
    assert jnp.allclose(out_small, ref_bf16(x_small), atol=1e-2, rtol=1e-2)
    assert jnp.allclose(out_small, ref_f32(x_small), atol=5e-2, rtol=5e-2)

    # Ragged multi-step grid path (TB=256, grid=3, last tile has 88 valid rows).
    x_big = jax.random.normal(kx2, (600, K_IN), jnp.float32)
    out_big = jax.block_until_ready(simple_model_forward(x_big, *params))
    assert out_big.shape == (600, N_OUT)
    assert jnp.allclose(out_big, ref_bf16(x_big), atol=1e-2, rtol=1e-2)
    assert jnp.allclose(out_big, ref_f32(x_big), atol=5e-2, rtol=5e-2)

    print("KERNEL_OK")
</pallas_src>

<mosaic_0001>
module attributes {stable_mosaic.version = 11 : i64} {
  func.func @_mlp_kernel(%arg0: i32, %arg1: memref<2x784xf32, #tpu.memory_space<vmem>>, %arg2: memref<784x128xbf16, #tpu.memory_space<vmem>>, %arg3: memref<1x128xf32, #tpu.memory_space<vmem>>, %arg4: memref<128x16xbf16, #tpu.memory_space<vmem>>, %arg5: memref<1x16xf32, #tpu.memory_space<vmem>>, %arg6: memref<2x16xf32, #tpu.memory_space<vmem>>) attributes {dimension_semantics = [#tpu.dimension_semantics<parallel>], iteration_bounds = array<i64: 1>, scalar_prefetch = 0 : i64, scratch_operands = 0 : i64, tpu.core_type = #tpu.core_type<tc>, window_params = [{transform_indices = @transform_0, window_bounds = array<i64: 2, 784>}, {pipeline_mode = #tpu.pipeline_mode<synchronous>, transform_indices = @transform_1, window_bounds = array<i64: 784, 128>}, {pipeline_mode = #tpu.pipeline_mode<synchronous>, transform_indices = @transform_2, window_bounds = array<i64: 1, 128>}, {pipeline_mode = #tpu.pipeline_mode<synchronous>, transform_indices = @transform_3, window_bounds = array<i64: 128, 16>}, {pipeline_mode = #tpu.pipeline_mode<synchronous>, transform_indices = @transform_4, window_bounds = array<i64: 1, 16>}, {transform_indices = @transform_5, window_bounds = array<i64: 2, 16>}]} {
    %c0 = arith.constant 0 : index
    %c0_0 = arith.constant 0 : index
    %0 = vector.load %arg1[%c0, %c0_0] : memref<2x784xf32, #tpu.memory_space<vmem>>, vector<2x784xf32>
    %1 = arith.truncf %0 : vector<2x784xf32> to vector<2x784xbf16>
    %c0_1 = arith.constant 0 : index
    %c0_2 = arith.constant 0 : index
    %2 = vector.load %arg2[%c0_1, %c0_2] : memref<784x128xbf16, #tpu.memory_space<vmem>>, vector<784x128xbf16>
    %cst = arith.constant dense<0.000000e+00> : vector<2x128xf32>
    %3 = tpu.matmul %1, %2, %cst {dimension_numbers = #tpu.dot_dimension_numbers<[1], [0], [0], [1], [0, 0, 1, 1], [], []>} : vector<2x784xbf16>, vector<784x128xbf16>, vector<2x128xf32> -> vector<2x128xf32>
    %c0_3 = arith.constant 0 : index
    %c0_4 = arith.constant 0 : index
    %4 = vector.load %arg3[%c0_3, %c0_4] : memref<1x128xf32, #tpu.memory_space<vmem>>, vector<1x128xf32>
    %5 = vector.broadcast %4 : vector<1x128xf32> to vector<2x128xf32>
    %6 = arith.addf %3, %5 : vector<2x128xf32>
    %cst_5 = arith.constant 0.000000e+00 : f32
    %7 = vector.broadcast %cst_5 : f32 to vector<2x128xf32>
    %8 = arith.maximumf %6, %7 : vector<2x128xf32>
    %9 = arith.truncf %8 : vector<2x128xf32> to vector<2x128xbf16>
    %c0_6 = arith.constant 0 : index
    %c0_7 = arith.constant 0 : index
    %10 = vector.load %arg4[%c0_6, %c0_7] : memref<128x16xbf16, #tpu.memory_space<vmem>>, vector<128x16xbf16>
    %cst_8 = arith.constant dense<0.000000e+00> : vector<2x16xf32>
    %11 = tpu.matmul %9, %10, %cst_8 {dimension_numbers = #tpu.dot_dimension_numbers<[1], [0], [0], [1], [0, 0, 1, 1], [], []>} : vector<2x128xbf16>, vector<128x16xbf16>, vector<2x16xf32> -> vector<2x16xf32>
    %c0_9 = arith.constant 0 : index
    %c0_10 = arith.constant 0 : index
    %12 = vector.load %arg5[%c0_9, %c0_10] : memref<1x16xf32, #tpu.memory_space<vmem>>, vector<1x16xf32>
    %13 = vector.broadcast %12 : vector<1x16xf32> to vector<2x16xf32>
    %14 = arith.addf %11, %13 : vector<2x16xf32>
    %c0_11 = arith.constant 0 : index
    %c0_12 = arith.constant 0 : index
    %15 = vector.load %arg6[%c0_11, %c0_12] : memref<2x16xf32, #tpu.memory_space<vmem>>, vector<2x16xf32>
    tpu.vector_store %arg6[%c0_11, %c0_12], %14 {strides = array<i32>} : memref<2x16xf32, #tpu.memory_space<vmem>>, vector<2x16xf32>,
    return
  }
  func.func @transform_0(%arg0: i32) -> (i32, i32) {
    %c0_i32 = arith.constant 0 : i32
    %c0_i32_0 = arith.constant 0 : i32
    return %arg0, %c0_i32 : i32, i32
  }
  func.func @transform_1(%arg0: i32) -> (i32, i32) {
    %c0_i32 = arith.constant 0 : i32
    %c0_i32_0 = arith.constant 0 : i32
    %c0_i32_1 = arith.constant 0 : i32
    return %c0_i32, %c0_i32_0 : i32, i32
  }
  func.func @transform_2(%arg0: i32) -> (i32, i32) {
    %c0_i32 = arith.constant 0 : i32
    %c0_i32_0 = arith.constant 0 : i32
    %c0_i32_1 = arith.constant 0 : i32
    return %c0_i32, %c0_i32_0 : i32, i32
  }
  func.func @transform_3(%arg0: i32) -> (i32, i32) {
    %c0_i32 = arith.constant 0 : i32
    %c0_i32_0 = arith.constant 0 : i32
    %c0_i32_1 = arith.constant 0 : i32
    return %c0_i32, %c0_i32_0 : i32, i32
  }
  func.func @transform_4(%arg0: i32) -> (i32, i32) {
    %c0_i32 = arith.constant 0 : i32
    %c0_i32_0 = arith.constant 0 : i32
    %c0_i32_1 = arith.constant 0 : i32
    return %c0_i32, %c0_i32_0 : i32, i32
  }
  func.func @transform_5(%arg0: i32) -> (i32, i32) {
    %c0_i32 = arith.constant 0 : i32
    %c0_i32_0 = arith.constant 0 : i32
    return %arg0, %c0_i32 : i32, i32
  }
}

</mosaic_0001>

<bundles_post_ra>
// kernel: simple_model_forward.1
= control target key start
LH: loop header
LB: loop body
LE: loop exit
PB: predicated region body
PF: predicated region fallthrough
CT: control target
= control target key end

     0   :  { %10 = vsyncpa [#allocation3], 0  ;;  %s1079_s0 = inlined_call_operand.vmem [shape: f32[2,784], index: 0, kind: input, shape index: {}]   ;;  %s1080_s1 = inlined_call_operand.hbm [shape: bf16[784,128], index: 1, kind: input, shape index: {}]   ;;  %s1081_s2 = inlined_call_operand.vmem [shape: f32[1,128], index: 2, kind: input, shape index: {}]   ;;  %s1082_s3 = inlined_call_operand.vmem [shape: bf16[128,16], index: 3, kind: input, shape index: {}]   ;;  %s1083_s4 = inlined_call_operand.vmem [shape: f32[1,16], index: 4, kind: input, shape index: {}]   ;;  %s1084_s5 = inlined_call_operand.hbm [shape: f32[2,16], index: 5, kind: output, shape index: {}]  }
   0x1   :  { %11 = vsyncpa [#allocation4], 0  ;;  %s18_s20 = sshll.u32 %s1080_s1, 4  ;;  %s1003_s21 = smov [#allocation2]   ;;  %s19_s20 = int_to_ptr.hbm [resolvable:$true] %s18_s20 }
   0x2   :  { %s20_s22 = sshll.u32 %s1003_s21, 4  ;;  %s1004_s23 = smov 64   ;;  %s21_s22 = int_to_ptr.vmem [resolvable:$true] %s20_s22 }
   0x3   :  { %s1005_s24 = smov 4  }
   0x4   :  { %26 = dma.hbm_to_vmem [thread:$0]  %s19_s20, 6272, %s21_s22, [#allocation3], %s1004_s23, %s1004_s23, %s1005_s24  }
   0x5   :  { %999 = dma.done.wait [#allocation3], 6272  }
   0x6   :  { %1000 = vsyncadd [#allocation3], 4294961024  ;;  %v895_v0 = vld [vmem:[#allocation2 + $0x38] sm:$0xff]  ;;  %v894_v3 = vld [vmem:[#allocation2 + $0x30] sm:$0xff]  ;;  %vm462_vm0 = vcmask 130048   ;;  %s1006_s20 = smov [#allocation5]  }
   0x7   :  { %v903_v1 = vld [vmem:[#allocation2 + $0x78] sm:$0xff]  ;;  %466 = vmatpush.bf16.msra.mxu0 %v895_v0  ;;  %v902_v4 = vld [vmem:[#allocation2 + $0x70] sm:$0xff]  ;;  %v893_v8 = vld [vmem:[#allocation2 + $0x28] sm:$0xff]  ;;  %s647_s21 = sshll.u32 %s1006_s20, 4  ;;  %s649_s24 = sshll.u32 %s1084_s5, 4  ;;  %vm640_vm1 = vcmask 123904   ;;  %s648_s21 = int_to_ptr.vmem [resolvable:$true] %s647_s21  ;;  %s650_s24 = int_to_ptr.hbm [resolvable:$true] %s649_s24 }
   0x8   :  { %v911_v2 = vld [vmem:[#allocation2 + $0xb8] sm:$0xff]  ;;  %479 = vmatpush.bf16.msra.mxu1 %v903_v1  ;;  %v910_v5 = vld [vmem:[#allocation2 + $0xb0] sm:$0xff]  ;;  %v901_v9 = vld [vmem:[#allocation2 + $0x68] sm:$0xff] }
   0x9   :  { %492 = vmatpush.bf16.msra.mxu2 %v911_v2  ;;  %v919_v6 = vld [vmem:[#allocation2 + $0xf8] sm:$0xff]  ;;  %v918_v7 = vld [vmem:[#allocation2 + $0xf0] sm:$0xff]  ;;  %v909_v10 = vld [vmem:[#allocation2 + $0xa8] sm:$0xff] }
   0xa   :  { %505 = vmatpush.bf16.msra.mxu3 %v919_v6  ;;  %v917_v11 = vld [vmem:[#allocation2 + $0xe8] sm:$0xff]  ;;  %v892_v12 = vld [vmem:[#allocation2 + $0x20] sm:$0xff]  ;;  %v38_v15 = vld [vmem:[%s1079_s0] sm:$0xff] }
   0xb   :  { %467 = vmatpush.bf16.msra.mxu0 %v894_v3  ;;  %v900_v13 = vld [vmem:[#allocation2 + $0x60] sm:$0xff]  ;;  %42 = vst [vmem:[#allocation1] ss:$4 sm:$0xff] %v38_v15  ;;  %v891_v17 = vld [vmem:[#allocation2 + $0x18] sm:$0xff]  ;;  %v890_v22 = vld [vmem:[#allocation2 + $0x10] sm:$0xff] }
   0xc   :  { %480 = vmatpush.bf16.msra.mxu1 %v902_v4  ;;  %v908_v14 = vld [vmem:[#allocation2 + $0xa0] sm:$0xff]  ;;  %v899_v18 = vld [vmem:[#allocation2 + $0x58] sm:$0xff]  ;;  %v898_v23 = vld [vmem:[#allocation2 + $0x50] sm:$0xff] }
   0xd   :  { %493 = vmatpush.bf16.msra.mxu2 %v910_v5  ;;  %v916_v16 = vld [vmem:[#allocation2 + $0xe0] sm:$0xff]  ;;  %v907_v20 = vld [vmem:[#allocation2 + $0x98] sm:$0xff]  ;;  %v906_v24 = vld [vmem:[#allocation2 + $0x90] sm:$0xff] }
   0xe   :  { %506 = vmatpush.bf16.msra.mxu3 %v918_v7  ;;  %v39_v19 = vld [vmem:[%s1079_s0 + $0x8] sm:$0x3f]  ;;  %v915_v21 = vld [vmem:[#allocation2 + $0xd8] sm:$0xff]  ;;  %v914_v25 = vld [vmem:[#allocation2 + $0xd0] sm:$0xff] }
   0xf   :  { %468 = vmatpush.bf16.msra.mxu0 %v893_v8  ;;  %44 = vst [vmem:[#allocation1 + $0x20] ss:$4 sm:$0xff] %v39_v19  ;;  %v889_v26 = vld [vmem:[#allocation2 + $0x8] sm:$0xff]  ;;  %v888_v29 = vld [vmem:[#allocation2] sm:$0xff]  ;;  %v927_v34 = vld [vmem:[#allocation2 + $0x138] sm:$0xff] }
  0x10   :  { %481 = vmatpush.bf16.msra.mxu1 %v901_v9  ;;  %v897_v27 = vld [vmem:[#allocation2 + $0x48] sm:$0xff]  ;;  %v896_v30 = vld [vmem:[#allocation2 + $0x40] sm:$0xff]  ;;  %v935_v35 = vld [vmem:[#allocation2 + $0x178] sm:$0xff] }
  0x11   :  { %494 = vmatpush.bf16.msra.mxu2 %v909_v10  ;;  %v905_v28 = vld [vmem:[#allocation2 + $0x88] sm:$0xff]  ;;  %v904_v36 = vld [vmem:[#allocation2 + $0x80] sm:$0xff]  ;;  %v926_v43 = vld [vmem:[#allocation2 + $0x130] sm:$0xff] }
  0x12   :  { %507 = vmatpush.bf16.msra.mxu3 %v917_v11  ;;  %v913_v31 = vld [vmem:[#allocation2 + $0xc8] sm:$0xff]  ;;  %v45_v32 = vld.sshfl [vmem:[#allocation1] sm:$0xff pattern:$0x73625140]  ;;  %v912_v40 = vld [vmem:[#allocation2 + $0xc0] sm:$0xff] }
  0x13   :  { %469 = vmatpush.bf16.msra.mxu0 %v892_v12  ;;  %v46_v33 = vld.sshfl [vmem:[#allocation1 + $0x8] sm:$0xff pattern:$0x73625140]  ;;  %v47_v37 = vld.sshfl [vmem:[#allocation1 + $0x10] sm:$0xff pattern:$0x73625140]  ;;  %v59_v38 = vpack.c.bf16 %v45_v32, %v45_v32 }
  0x14   :  { %482 = vmatpush.bf16.msra.mxu1 %v900_v13  ;;  %v60_v39 = vpack.c.bf16 %v46_v33, %v46_v33  ;;  %v936_v41 = vld [vmem:[#allocation2 + $0x180] sm:$0xff]  ;;  %v48_v42 = vld.sshfl [vmem:[#allocation1 + $0x18] sm:$0xff pattern:$0x73625140]  ;;  %v61_v45 = vpack.c.bf16 %v47_v37, %v47_v37  ;;  %v925_v47 = vld [vmem:[#allocation2 + $0x128] sm:$0xff] }
  0x15   :  { %495 = vmatpush.bf16.msra.mxu2 %v908_v14  ;;  %v934_v44 = vld [vmem:[#allocation2 + $0x170] sm:$0xff]  ;;  %v62_v46 = vpack.c.bf16 %v48_v42, %v48_v42  ;;  %v933_v48 = vld [vmem:[#allocation2 + $0x168] sm:$0xff]  ;;  %v924_v49 = vld [vmem:[#allocation2 + $0x120] sm:$0xff] }
  0x16   :  { %508 = vmatpush.bf16.msra.mxu3 %v916_v16  ;;  %v932_v50 = vld [vmem:[#allocation2 + $0x160] sm:$0xff]  ;;  %v923_v51 = vld [vmem:[#allocation2 + $0x118] sm:$0xff]  ;;  %v51_v53 = vld.sshfl [vmem:[#allocation1 + $0x30] sm:$0xff pattern:$0x73625140] }
  0x17   :  { %470 = vmatpush.bf16.msra.mxu0 %v891_v17  ;;  %v931_v52 = vld [vmem:[#allocation2 + $0x158] sm:$0xff]  ;;  %v922_v54 = vld [vmem:[#allocation2 + $0x110] sm:$0xff]  ;;  %v65_v56 = vpack.c.bf16 %v51_v53, %v51_v53  ;;  %v921_v57 = vld [vmem:[#allocation2 + $0x108] sm:$0xff] }
  0x18   :  { %483 = vmatpush.bf16.msra.mxu1 %v899_v18  ;;  %v930_v55 = vld [vmem:[#allocation2 + $0x150] sm:$0xff]  ;;  %v929_v58 = vld [vmem:[#allocation2 + $0x148] sm:$0xff]  ;;  %v920_v59 = vld [vmem:[#allocation2 + $0x100] sm:$0xff] }
  0x19   :  { %496 = vmatpush.bf16.msra.mxu2 %v907_v20  ;;  %v928_v60 = vld [vmem:[#allocation2 + $0x140] sm:$0xff]  ;;  %v49_v61 = vld.sshfl [vmem:[#allocation1 + $0x20] sm:$0xff pattern:$0x73625140]  ;;  %v944_v1 = vld [vmem:[%s1082_s3 + $0x38] sm:$0xff] }
  0x1a   :  { %509 = vmatpush.bf16.msra.mxu3 %v915_v21  ;;  %v50_v62 = vld.sshfl [vmem:[#allocation1 + $0x28] sm:$0xff pattern:$0x73625140]  ;;  %v63_v63 = vpack.c.bf16 %v49_v61, %v49_v61  ;;  %v943_v2 = vld [vmem:[%s1082_s3 + $0x30] sm:$0xff]  ;;  %v941_v4 = vld [vmem:[%s1082_s3 + $0x20] sm:$0xff] }
  0x1b   :  { %471 = vmatpush.bf16.msra.mxu0 %v890_v22  ;;  %v64_v0 = vpack.c.bf16 %v50_v62, %v50_v62  ;;  %v942_v3 = vld [vmem:[%s1082_s3 + $0x28] sm:$0xff]  ;;  %v940_v5 = vld [vmem:[%s1082_s3 + $0x18] sm:$0xff]  ;;  %v939_v6 = vld [vmem:[%s1082_s3 + $0x10] sm:$0xff] }
  0x1c   :  { %484 = vmatpush.bf16.msra.mxu1 %v898_v23  ;;  %v938_v7 = vld [vmem:[%s1082_s3 + $0x8] sm:$0xff]  ;;  %v937_v10 = vld [vmem:[%s1082_s3] sm:$0xff] }
  0x1d   :  { %497 = vmatpush.bf16.msra.mxu2 %v906_v24  ;;  %v949_v15 = vld [vmem:[%s1081_s2] ss:$0 sm:$0xff] }
  0x1e   :  { %510 = vmatpush.bf16.msra.mxu3 %v914_v25  ;;  %v950_v33 = vld [vmem:[%s1083_s4] ss:$0 sm:$0xff] }
  0x1f   :  { %472 = vmatpush.bf16.msra.mxu0 %v889_v26 }
  0x20   :  { %485 = vmatpush.bf16.msra.mxu1 %v897_v27 }
  0x21   :  { %498 = vmatpush.bf16.msra.mxu2 %v905_v28 }
  0x22   :  { %511 = vmatpush.bf16.msra.mxu3 %v913_v31 }
  0x23   :  { %473 = vmatpush.bf16.msra.mxu0 %v888_v29 }
  0x24   :  { %486 = vmatpush.bf16.msra.mxu1 %v896_v30 }
  0x25   :  { %499 = vmatpush.bf16.msra.mxu2 %v904_v36 }
  0x26   :  { %474 = vmatmul.bf16.vlgmr.msra.gmra.mxu0 %v59_v38  ;;  %512 = vmatpush.bf16.msra.mxu3 %v912_v40 }
  0x27   :  { %518 = vmatpush.bf16.msrb.mxu0 %v927_v34  ;;  %487 = vmatmul.bf16.vlgmr.msra.gmra.mxu1 %v60_v39 }
  0x28   :  { %531 = vmatpush.bf16.msrb.mxu1 %v935_v35  ;;  %500 = vmatmul.bf16.vlgmr.msra.gmra.mxu2 %v61_v45 }
  0x29   :  { %551 = vmatpush.bf16.msrb.mxu2 %v936_v41  ;;  %513 = vmatmul.bf16.vlgmr.msra.gmra.mxu3 %v62_v46 }
  0x2a   :  { %627 = vmatpush.bf16.msrb.mxu3 %v944_v1 }
  0x2b   :  { %519 = vmatpush.bf16.msrb.mxu0 %v926_v43 }
  0x2c   :  { %532 = vmatpush.bf16.msrb.mxu1 %v934_v44 }
  0x2e   :  { %628 = vmatpush.bf16.msrb.mxu3 %v943_v2 }
  0x2f   :  { %520 = vmatpush.bf16.msrb.mxu0 %v925_v47 }
  0x30   :  { %533 = vmatpush.bf16.msrb.mxu1 %v933_v48 }
  0x32   :  { %629 = vmatpush.bf16.msrb.mxu3 %v942_v3 }
  0x33   :  { %521 = vmatpush.bf16.msrb.mxu0 %v924_v49 }
  0x34   :  { %534 = vmatpush.bf16.msrb.mxu1 %v932_v50 }
  0x36   :  { %630 = vmatpush.bf16.msrb.mxu3 %v941_v4 }
  0x37   :  { %522 = vmatpush.bf16.msrb.mxu0 %v923_v51 }
  0x38   :  { %535 = vmatpush.bf16.msrb.mxu1 %v931_v52  ;;  %855 = vmatmul.msk.bf16.vlgmr.msrb.gmra.mxu2 %vm462_vm0, %v65_v56 }
  0x3a   :  { %631 = vmatpush.bf16.msrb.mxu3 %v940_v5 }
  0x3b   :  { %523 = vmatpush.bf16.msrb.mxu0 %v922_v54 }
  0x3c   :  { %536 = vmatpush.bf16.msrb.mxu1 %v930_v55 }
  0x3e   :  { %632 = vmatpush.bf16.msrb.mxu3 %v939_v6 }
  0x3f   :  { %524 = vmatpush.bf16.msrb.mxu0 %v921_v57 }
  0x40   :  { %537 = vmatpush.bf16.msrb.mxu1 %v929_v58 }
  0x42   :  { %633 = vmatpush.bf16.msrb.mxu3 %v938_v7 }
  0x43   :  { %525 = vmatpush.bf16.msrb.mxu0 %v920_v59 }
  0x44   :  { %538 = vmatpush.bf16.msrb.mxu1 %v928_v60 }
  0x46   :  { %526 = vmatmul.bf16.vlgmr.msrb.gmra.mxu0 %v63_v63  ;;  %634 = vmatpush.bf16.msrb.mxu3 %v937_v10 }
  0x47   :  { %539 = vmatmul.bf16.vlgmr.msrb.gmra.mxu1 %v64_v0 }
  0xa3   :  { %v475_v8 = vpop.f32.mrf.mxu0 }
  0xa4   :  { %v488_v9 = vpop.f32.mrf.mxu1  ;;  %v476_v16 = vadd.f32 %v949_v15, %v475_v8 }
  0xa6   :  { %v489_v19 = vadd.f32 %v488_v9, %v476_v16 }
  0xab   :  { %v477_v11 = vpop.f32.mrf.mxu0  ;;  %v501_v13 = vpop.f32.mrf.mxu2 }
  0xac   :  { %v490_v12 = vpop.f32.mrf.mxu1  ;;  %v514_v14 = vpop.f32.mrf.mxu3  ;;  %v502_v20 = vadd.f32 %v501_v13, %v489_v19 }
  0xae   :  { %v515_v22 = vadd.f32 %v514_v14, %v502_v20 }
  0xb3   :  { %v503_v17 = vpop.f32.mrf.mxu2 }
  0xb4   :  { %v516_v18 = vpop.f32.mrf.mxu3 }
  0xbb   :  { %v553_v21 = vpop.f32.mrf.mxu2 }
  0xc3   :  { %v527_v23 = vpop.f32.mrf.mxu0  ;;  %v555_v27 = vpop.f32.mrf.mxu2 }
  0xc4   :  { %v540_v24 = vpop.f32.mrf.mxu1  ;;  %v528_v25 = vadd.f32 %v527_v23, %v515_v22 }
  0xc6   :  { %v541_v26 = vadd.f32 %v540_v24, %v528_v25 }
  0xc8   :  { %v554_v28 = vadd.f32 %v553_v21, %v541_v26 }
  0xca   :  { %v557_v29 = vmax.f32 %v554_v28, 0.0 }
  0xcb   :  { %v529_v30 = vpop.f32.mrf.mxu0 }
  0xcc   :  { %v542_v31 = vpop.f32.mrf.mxu1  ;;  %v558_v32 = vpack.c.bf16 %v557_v29, %v557_v29 }
  0xce   :  { %635 = vmatmul.bf16.vlgmr.msrb.gmra.mxu3 %v558_v32 }
 0x151   :  { %v636_v34 = vpop.f32.mrf.mxu3 }
 0x152   :  { %v637_v35 = vadd.f32 %v950_v33, %v636_v34 }
 0x154   :  { %641 = vst.msk [vmem:[#allocation5] sm:$0x3] %vm640_vm1, %v637_v35 }
 0x155   :  { %652 = dma.vmem_to_hbm [thread:$0]  %s648_s21, 32, %s650_s24, [#allocation4]  }
 0x159   :  { %v638_v36 = vpop.f32.mrf.mxu3 }
 0x15a   :  { %1001 = dma.done.wait [#allocation4], 32  }
 0x15b   :  { %1002 = vsyncadd [#allocation4], 4294967264 }
 0x15c   :  { %657 = vsyncpa [#allocation3], 1 }
 0x15d   :  { %658 = vsyncpa [#allocation4], 1 }

</bundles_post_ra>
